<compile_context>
chip_gen: v7x
topology: tpu7x:2x2x1
jax: 0.10.0
libtpu: 0.0.40
codegen_flags: <defaults>
</compile_context>

<pallas_src>
import functools

import jax
import jax.numpy as jnp
from jax.experimental import pallas as pl
from jax.experimental.pallas import tpu as pltpu

LANES = 128          # vreg lane width
SUBLANES = 8         # vreg sublane count
MAX_TILE_ROWS = 4096  # (4096, 128) f32 tile = 2 MiB per buffer
HIDDEN = 10


def _round_up(a, b):
    return ((a + b - 1) // b) * b


def mlp_kernel(params_ref, x_ref, o_ref, *, compute_dtype):
    """Pure-VPU MLP on a lane-dense (tile_rows, 128) slab.

    params_ref: (31,) f32 in SMEM, packed [w1(10) | b1(10) | w2(10) | b2(1)].
    out = sum_j relu(x * w1[j] + b1[j]) * w2[j] + b2
    """
    cd = compute_dtype
    x = x_ref[...].astype(cd)            # load once (no-op cast when f32)

    def p(i):                            # scalar param read from SMEM
        return params_ref[i].astype(cd)

    # j = 0 folded into the accumulator init together with b2: saves the
    # zeros materialization and the trailing full-tile add.
    acc = jnp.maximum(x * p(0) + p(HIDDEN), 0) * p(2 * HIDDEN) + p(3 * HIDDEN)
    for j in range(1, HIDDEN):           # static -> fully unrolled
        h = jnp.maximum(x * p(j) + p(HIDDEN + j), 0)
        acc = acc + h * p(2 * HIDDEN + j)
    o_ref[...] = acc.astype(o_ref.dtype)


def net_forward(x, w1, b1, w2, b2, *, compute_dtype=jnp.float32):
    """x: (N, 1) f32. Params in (in, out) layout: w1 (1,10), b1 (1,10),
    w2 (10,1), b2 (1,1). Returns (N, 1) f32."""
    N = x.shape[0]
    dtype = x.dtype

    # --- pack all params into one flat SMEM array (single tiny transfer) ----
    params = jnp.concatenate(
        [w1.reshape(-1), b1.reshape(-1), w2.reshape(-1), b2.reshape(-1)]
    ).astype(jnp.float32)                # (31,)

    # --- lane-dense view of the batch: (rows, 128) ---------------------------
    rows = pl.cdiv(N, LANES)
    ragged = rows * LANES != N
    if ragged:
        # Ragged tail only (e.g. the tiny demo batch): one pad copy. When
        # N % 128 == 0 this branch is skipped and the reshape is free.
        xf = jnp.pad(x.reshape(-1), (0, rows * LANES - N))
    else:
        xf = x.reshape(-1)               # metadata-only
    x2d = xf.reshape(rows, LANES)

    # --- tile selection: balanced, sublane-aligned, >=2 tiles when possible --
    if rows <= SUBLANES:
        tile_rows = rows                 # single block equal to full dim
    else:
        min_tiles = 2 if rows >= 2 * SUBLANES else 1  # keep both v7x TCs busy
        n_tiles = max(pl.cdiv(rows, MAX_TILE_ROWS), min_tiles)
        tile_rows = _round_up(pl.cdiv(rows, n_tiles), SUBLANES)
        tile_rows = min(tile_rows, rows)
    grid = (pl.cdiv(rows, tile_rows),)   # ragged last block handled by Pallas

    smem = pl.BlockSpec(memory_space=pltpu.MemorySpace.SMEM)
    kernel = functools.partial(mlp_kernel, compute_dtype=compute_dtype)

    out2d = pl.pallas_call(
        kernel,
        out_shape=jax.ShapeDtypeStruct((rows, LANES), dtype),
        grid_spec=pltpu.PrefetchScalarGridSpec(
            num_scalar_prefetch=0,
            grid=grid,
            in_specs=[
                smem,                                            # packed params
                pl.BlockSpec((tile_rows, LANES), lambda i: (i, 0)),
            ],
            out_specs=pl.BlockSpec((tile_rows, LANES), lambda i: (i, 0)),
        ),
        compiler_params=pltpu.CompilerParams(
            dimension_semantics=("parallel",),
            vmem_limit_bytes=32 * 1024 * 1024,
        ),
    )(params, x2d)

    if ragged:
        return out2d.reshape(-1)[:N].reshape(N, 1)
    return out2d.reshape(N, 1)           # metadata-only


def init_params(key):
    # PyTorch nn.Linear default init: U(-1/sqrt(fan_in), 1/sqrt(fan_in)).
    k1, k2, k3, k4 = jax.random.split(key, 4)
    in1, hid, out = 1, HIDDEN, 1
    bound1 = 1.0 / jnp.sqrt(in1)
    bound2 = 1.0 / jnp.sqrt(hid)
    # stored as (in, out) == transpose of PyTorch's (out, in) weight
    w1 = jax.random.uniform(k1, (in1, hid), jnp.float32, -bound1, bound1)
    b1 = jax.random.uniform(k2, (1, hid), jnp.float32, -bound1, bound1)
    w2 = jax.random.uniform(k3, (hid, out), jnp.float32, -bound2, bound2)
    b2 = jax.random.uniform(k4, (1, out), jnp.float32, -bound2, bound2)
    return w1, b1, w2, b2


def reference_forward(x, w1, b1, w2, b2):
    hp = jax.lax.Precision.HIGHEST
    h = jnp.maximum(jnp.dot(x, w1, precision=hp) + b1, 0.0)
    return jnp.dot(h, w2, precision=hp) + b2


if __name__ == "__main__":
    key = jax.random.PRNGKey(0)
    k_params, k_x = jax.random.split(key)
    w1, b1, w2, b2 = init_params(k_params)

    # Small demo batch matching the module (Linear(1,10) -> relu -> Linear(10,1)).
    N = 8
    x = jax.random.normal(k_x, (N, 1), jnp.float32)
    out = jax.block_until_ready(net_forward(x, w1, b1, w2, b2))
    ref = reference_forward(x, w1, b1, w2, b2)
    assert out.shape == (N, 1)
    assert jnp.allclose(out, ref, atol=1e-5, rtol=1e-5)

    # Extra coverage: lane-multiple batch that exercises the copy-free path,
    # the balanced 2-tile grid, and Pallas partial-edge-block masking.
    for n_extra in (2176, 300):  # 2176 = 17*128 (no pad), 300 = ragged
        xe = jax.random.normal(jax.random.PRNGKey(n_extra), (n_extra, 1),
                               jnp.float32)
        oe = jax.block_until_ready(net_forward(xe, w1, b1, w2, b2))
        re_ = reference_forward(xe, w1, b1, w2, b2)
        assert oe.shape == (n_extra, 1)
        assert jnp.allclose(oe, re_, atol=1e-5, rtol=1e-5)

    print("KERNEL_OK")
</pallas_src>

<mosaic_0001>
module attributes {stable_mosaic.version = 11 : i64} {
  func.func @mlp_kernel(%arg0: i32, %arg1: memref<31xf32, #tpu.memory_space<smem>>, %arg2: memref<1x128xf32, #tpu.memory_space<vmem>>, %arg3: memref<1x128xf32, #tpu.memory_space<vmem>>) attributes {dimension_semantics = [#tpu.dimension_semantics<parallel>], iteration_bounds = array<i64: 1>, scalar_prefetch = 0 : i64, scratch_operands = 0 : i64, tpu.core_type = #tpu.core_type<tc>, window_params = [{transform_indices = @transform_0, window_bounds = array<i64: 31>}, {transform_indices = @transform_1, window_bounds = array<i64: 1, 128>}, {transform_indices = @transform_2, window_bounds = array<i64: 1, 128>}]} {
    %c0 = arith.constant 0 : index
    %c0_0 = arith.constant 0 : index
    %0 = vector.load %arg2[%c0, %c0_0] : memref<1x128xf32, #tpu.memory_space<vmem>>, vector<1x128xf32>
    %c0_1 = arith.constant 0 : index
    %1 = memref.load %arg1[%c0_1] : memref<31xf32, #tpu.memory_space<smem>>
    %2 = vector.broadcast %1 : f32 to vector<1x128xf32>
    %3 = arith.mulf %0, %2 : vector<1x128xf32>
    %c10 = arith.constant 10 : index
    %4 = memref.load %arg1[%c10] : memref<31xf32, #tpu.memory_space<smem>>
    %5 = vector.broadcast %4 : f32 to vector<1x128xf32>
    %6 = arith.addf %3, %5 : vector<1x128xf32>
    %cst = arith.constant 0.000000e+00 : f32
    %7 = vector.broadcast %cst : f32 to vector<1x128xf32>
    %8 = arith.maximumf %6, %7 : vector<1x128xf32>
    %c20 = arith.constant 20 : index
    %9 = memref.load %arg1[%c20] : memref<31xf32, #tpu.memory_space<smem>>
    %10 = vector.broadcast %9 : f32 to vector<1x128xf32>
    %11 = arith.mulf %8, %10 : vector<1x128xf32>
    %c30 = arith.constant 30 : index
    %12 = memref.load %arg1[%c30] : memref<31xf32, #tpu.memory_space<smem>>
    %13 = vector.broadcast %12 : f32 to vector<1x128xf32>
    %14 = arith.addf %11, %13 : vector<1x128xf32>
    %c1 = arith.constant 1 : index
    %15 = memref.load %arg1[%c1] : memref<31xf32, #tpu.memory_space<smem>>
    %16 = vector.broadcast %15 : f32 to vector<1x128xf32>
    %17 = arith.mulf %0, %16 : vector<1x128xf32>
    %c11 = arith.constant 11 : index
    %18 = memref.load %arg1[%c11] : memref<31xf32, #tpu.memory_space<smem>>
    %19 = vector.broadcast %18 : f32 to vector<1x128xf32>
    %20 = arith.addf %17, %19 : vector<1x128xf32>
    %cst_2 = arith.constant 0.000000e+00 : f32
    %21 = vector.broadcast %cst_2 : f32 to vector<1x128xf32>
    %22 = arith.maximumf %20, %21 : vector<1x128xf32>
    %c21 = arith.constant 21 : index
    %23 = memref.load %arg1[%c21] : memref<31xf32, #tpu.memory_space<smem>>
    %24 = vector.broadcast %23 : f32 to vector<1x128xf32>
    %25 = arith.mulf %22, %24 : vector<1x128xf32>
    %26 = arith.addf %14, %25 : vector<1x128xf32>
    %c2 = arith.constant 2 : index
    %27 = memref.load %arg1[%c2] : memref<31xf32, #tpu.memory_space<smem>>
    %28 = vector.broadcast %27 : f32 to vector<1x128xf32>
    %29 = arith.mulf %0, %28 : vector<1x128xf32>
    %c12 = arith.constant 12 : index
    %30 = memref.load %arg1[%c12] : memref<31xf32, #tpu.memory_space<smem>>
    %31 = vector.broadcast %30 : f32 to vector<1x128xf32>
    %32 = arith.addf %29, %31 : vector<1x128xf32>
    %cst_3 = arith.constant 0.000000e+00 : f32
    %33 = vector.broadcast %cst_3 : f32 to vector<1x128xf32>
    %34 = arith.maximumf %32, %33 : vector<1x128xf32>
    %c22 = arith.constant 22 : index
    %35 = memref.load %arg1[%c22] : memref<31xf32, #tpu.memory_space<smem>>
    %36 = vector.broadcast %35 : f32 to vector<1x128xf32>
    %37 = arith.mulf %34, %36 : vector<1x128xf32>
    %38 = arith.addf %26, %37 : vector<1x128xf32>
    %c3 = arith.constant 3 : index
    %39 = memref.load %arg1[%c3] : memref<31xf32, #tpu.memory_space<smem>>
    %40 = vector.broadcast %39 : f32 to vector<1x128xf32>
    %41 = arith.mulf %0, %40 : vector<1x128xf32>
    %c13 = arith.constant 13 : index
    %42 = memref.load %arg1[%c13] : memref<31xf32, #tpu.memory_space<smem>>
    %43 = vector.broadcast %42 : f32 to vector<1x128xf32>
    %44 = arith.addf %41, %43 : vector<1x128xf32>
    %cst_4 = arith.constant 0.000000e+00 : f32
    %45 = vector.broadcast %cst_4 : f32 to vector<1x128xf32>
    %46 = arith.maximumf %44, %45 : vector<1x128xf32>
    %c23 = arith.constant 23 : index
    %47 = memref.load %arg1[%c23] : memref<31xf32, #tpu.memory_space<smem>>
    %48 = vector.broadcast %47 : f32 to vector<1x128xf32>
    %49 = arith.mulf %46, %48 : vector<1x128xf32>
    %50 = arith.addf %38, %49 : vector<1x128xf32>
    %c4 = arith.constant 4 : index
    %51 = memref.load %arg1[%c4] : memref<31xf32, #tpu.memory_space<smem>>
    %52 = vector.broadcast %51 : f32 to vector<1x128xf32>
    %53 = arith.mulf %0, %52 : vector<1x128xf32>
    %c14 = arith.constant 14 : index
    %54 = memref.load %arg1[%c14] : memref<31xf32, #tpu.memory_space<smem>>
    %55 = vector.broadcast %54 : f32 to vector<1x128xf32>
    %56 = arith.addf %53, %55 : vector<1x128xf32>
    %cst_5 = arith.constant 0.000000e+00 : f32
    %57 = vector.broadcast %cst_5 : f32 to vector<1x128xf32>
    %58 = arith.maximumf %56, %57 : vector<1x128xf32>
    %c24 = arith.constant 24 : index
    %59 = memref.load %arg1[%c24] : memref<31xf32, #tpu.memory_space<smem>>
    %60 = vector.broadcast %59 : f32 to vector<1x128xf32>
    %61 = arith.mulf %58, %60 : vector<1x128xf32>
    %62 = arith.addf %50, %61 : vector<1x128xf32>
    %c5 = arith.constant 5 : index
    %63 = memref.load %arg1[%c5] : memref<31xf32, #tpu.memory_space<smem>>
    %64 = vector.broadcast %63 : f32 to vector<1x128xf32>
    %65 = arith.mulf %0, %64 : vector<1x128xf32>
    %c15 = arith.constant 15 : index
    %66 = memref.load %arg1[%c15] : memref<31xf32, #tpu.memory_space<smem>>
    %67 = vector.broadcast %66 : f32 to vector<1x128xf32>
    %68 = arith.addf %65, %67 : vector<1x128xf32>
    %cst_6 = arith.constant 0.000000e+00 : f32
    %69 = vector.broadcast %cst_6 : f32 to vector<1x128xf32>
    %70 = arith.maximumf %68, %69 : vector<1x128xf32>
    %c25 = arith.constant 25 : index
    %71 = memref.load %arg1[%c25] : memref<31xf32, #tpu.memory_space<smem>>
    %72 = vector.broadcast %71 : f32 to vector<1x128xf32>
    %73 = arith.mulf %70, %72 : vector<1x128xf32>
    %74 = arith.addf %62, %73 : vector<1x128xf32>
    %c6 = arith.constant 6 : index
    %75 = memref.load %arg1[%c6] : memref<31xf32, #tpu.memory_space<smem>>
    %76 = vector.broadcast %75 : f32 to vector<1x128xf32>
    %77 = arith.mulf %0, %76 : vector<1x128xf32>
    %c16 = arith.constant 16 : index
    %78 = memref.load %arg1[%c16] : memref<31xf32, #tpu.memory_space<smem>>
    %79 = vector.broadcast %78 : f32 to vector<1x128xf32>
    %80 = arith.addf %77, %79 : vector<1x128xf32>
    %cst_7 = arith.constant 0.000000e+00 : f32
    %81 = vector.broadcast %cst_7 : f32 to vector<1x128xf32>
    %82 = arith.maximumf %80, %81 : vector<1x128xf32>
    %c26 = arith.constant 26 : index
    %83 = memref.load %arg1[%c26] : memref<31xf32, #tpu.memory_space<smem>>
    %84 = vector.broadcast %83 : f32 to vector<1x128xf32>
    %85 = arith.mulf %82, %84 : vector<1x128xf32>
    %86 = arith.addf %74, %85 : vector<1x128xf32>
    %c7 = arith.constant 7 : index
    %87 = memref.load %arg1[%c7] : memref<31xf32, #tpu.memory_space<smem>>
    %88 = vector.broadcast %87 : f32 to vector<1x128xf32>
    %89 = arith.mulf %0, %88 : vector<1x128xf32>
    %c17 = arith.constant 17 : index
    %90 = memref.load %arg1[%c17] : memref<31xf32, #tpu.memory_space<smem>>
    %91 = vector.broadcast %90 : f32 to vector<1x128xf32>
    %92 = arith.addf %89, %91 : vector<1x128xf32>
    %cst_8 = arith.constant 0.000000e+00 : f32
    %93 = vector.broadcast %cst_8 : f32 to vector<1x128xf32>
    %94 = arith.maximumf %92, %93 : vector<1x128xf32>
    %c27 = arith.constant 27 : index
    %95 = memref.load %arg1[%c27] : memref<31xf32, #tpu.memory_space<smem>>
    %96 = vector.broadcast %95 : f32 to vector<1x128xf32>
    %97 = arith.mulf %94, %96 : vector<1x128xf32>
    %98 = arith.addf %86, %97 : vector<1x128xf32>
    %c8 = arith.constant 8 : index
    %99 = memref.load %arg1[%c8] : memref<31xf32, #tpu.memory_space<smem>>
    %100 = vector.broadcast %99 : f32 to vector<1x128xf32>
    %101 = arith.mulf %0, %100 : vector<1x128xf32>
    %c18 = arith.constant 18 : index
    %102 = memref.load %arg1[%c18] : memref<31xf32, #tpu.memory_space<smem>>
    %103 = vector.broadcast %102 : f32 to vector<1x128xf32>
    %104 = arith.addf %101, %103 : vector<1x128xf32>
    %cst_9 = arith.constant 0.000000e+00 : f32
    %105 = vector.broadcast %cst_9 : f32 to vector<1x128xf32>
    %106 = arith.maximumf %104, %105 : vector<1x128xf32>
    %c28 = arith.constant 28 : index
    %107 = memref.load %arg1[%c28] : memref<31xf32, #tpu.memory_space<smem>>
    %108 = vector.broadcast %107 : f32 to vector<1x128xf32>
    %109 = arith.mulf %106, %108 : vector<1x128xf32>
    %110 = arith.addf %98, %109 : vector<1x128xf32>
    %c9 = arith.constant 9 : index
    %111 = memref.load %arg1[%c9] : memref<31xf32, #tpu.memory_space<smem>>
    %112 = vector.broadcast %111 : f32 to vector<1x128xf32>
    %113 = arith.mulf %0, %112 : vector<1x128xf32>
    %c19 = arith.constant 19 : index
    %114 = memref.load %arg1[%c19] : memref<31xf32, #tpu.memory_space<smem>>
    %115 = vector.broadcast %114 : f32 to vector<1x128xf32>
    %116 = arith.addf %113, %115 : vector<1x128xf32>
    %cst_10 = arith.constant 0.000000e+00 : f32
    %117 = vector.broadcast %cst_10 : f32 to vector<1x128xf32>
    %118 = arith.maximumf %116, %117 : vector<1x128xf32>
    %c29 = arith.constant 29 : index
    %119 = memref.load %arg1[%c29] : memref<31xf32, #tpu.memory_space<smem>>
    %120 = vector.broadcast %119 : f32 to vector<1x128xf32>
    %121 = arith.mulf %118, %120 : vector<1x128xf32>
    %122 = arith.addf %110, %121 : vector<1x128xf32>
    %c0_11 = arith.constant 0 : index
    %c0_12 = arith.constant 0 : index
    %123 = vector.load %arg3[%c0_11, %c0_12] : memref<1x128xf32, #tpu.memory_space<vmem>>, vector<1x128xf32>
    tpu.vector_store %arg3[%c0_11, %c0_12], %122 {strides = array<i32>} : memref<1x128xf32, #tpu.memory_space<vmem>>, vector<1x128xf32>,
    return
  }
  func.func @transform_0(%arg0: i32) -> i32 {
    %c0_i32 = arith.constant 0 : i32
    %c0_i32_0 = arith.constant 0 : i32
    return %c0_i32 : i32
  }
  func.func @transform_1(%arg0: i32) -> (i32, i32) {
    %c0_i32 = arith.constant 0 : i32
    %c0_i32_0 = arith.constant 0 : i32
    return %arg0, %c0_i32 : i32, i32
  }
  func.func @transform_2(%arg0: i32) -> (i32, i32) {
    %c0_i32 = arith.constant 0 : i32
    %c0_i32_0 = arith.constant 0 : i32
    return %arg0, %c0_i32 : i32, i32
  }
}

</mosaic_0001>

<bundles_post_ra>
// kernel: tpu_custom_call.1
= control target key start
LH: loop header
LB: loop body
LE: loop exit
PB: predicated region body
PF: predicated region fallthrough
CT: control target
= control target key end

     0   :  { %7 = vsyncpa [#allocation4], 0  ;;  %s354_s0 = inlined_call_operand.hbm [shape: f32[31], index: 0, kind: input, shape index: {}]   ;;  %s355_s1 = inlined_call_operand.vmem [shape: f32[1,128], index: 1, kind: input, shape index: {}]   ;;  %s356_s2 = inlined_call_operand.hbm [shape: f32[1,128], index: 2, kind: output, shape index: {}]  }
   0x1   :  { %8 = vsyncpa [#allocation3], 0  ;;  %s184_s11 = scalar_lea.hbm %s354_s0, 16 }
   0x2   :  { %p185_p0 = scmp.ne.s32.totalorder %s354_s0, %s184_s11  ;;  %p188_p1 = scmp.lt.u32.totalorder %s184_s11, %s354_s0 }
   0x4   :  { %p190_p2 = pnand %p188_p1, %p185_p0 }
   0x6   :  { %193 = shalt.err (!%p190_p2)
}
   0x7   :  { %s220_s16 = smov [#allocation2]  }
   0x8   :  { %16 = dma.hbm_to_smem %s354_s0, 16, %s220_s16, [#allocation4]  }
   0x9   :  { %216 = dma.done.wait [#allocation4], 16  }
   0xa   :  { %217 = vsyncadd [#allocation4], 4294967280 }
   0xb   :  { %22 = sfence }
   0xc   :  { %s24_s19 = sld [smem:[#allocation2]]  ;;  %s152_s20 = sld [smem:[#allocation2 + $0xa]]  ;;  %v260_v0 = vld [vmem:[%s355_s1] sm:$0x1] }
   0xd   :  { %s249_s21 = sld [smem:[#allocation2 + $0x14]]  ;;  %s251_s22 = sld [smem:[#allocation2 + $0x1e]] }
   0xe   :  { %s155_s23 = sld [smem:[#allocation2 + $0x1]]  ;;  %s253_s24 = sld [smem:[#allocation2 + $0xb]] }
   0xf   :  { %s255_s25 = sld [smem:[#allocation2 + $0x15]]  ;;  %s158_s26 = sld [smem:[#allocation2 + $0x2]] }
  0x10   :  { %s262_s0 = sld [smem:[#allocation2 + $0xc]]  ;;  %s264_s29 = sld [smem:[#allocation2 + $0x16]] }
  0x11   :  { %s266_s30 = sld [smem:[#allocation2 + $0x3]]  ;;  %s268_s3 = sld [smem:[#allocation2 + $0xd]] }
  0x12   :  { %v25_v1 = vstv %s24_s19  ;;  %v28_v2 = vstv %s152_s20  ;;  %s270_s4 = sld [smem:[#allocation2 + $0x17]]  ;;  %s272_s5 = sld [smem:[#allocation2 + $0x4]] }
  0x13   :  { %v26_v3 = vmul.f32 %v25_v1, %v260_v0  ;;  %s275_s1 = sld [smem:[#allocation2 + $0xe]]  ;;  %s277_s6 = sld [smem:[#allocation2 + $0x18]]  ;;  %v32_v7 = vstv %s249_s21  ;;  %v35_v10 = vstv %s251_s22 }
  0x14   :  { %v38_v4 = vstv %s155_s23  ;;  %v41_v5 = vstv %s253_s24  ;;  %s280_s7 = sld [smem:[#allocation2 + $0x5]]  ;;  %s282_s8 = sld [smem:[#allocation2 + $0xf]] }
  0x15   :  { %v29_v6 = vadd.f32 %v28_v2, %v26_v3  ;;  %v39_v8 = vmul.f32 %v38_v4, %v260_v0  ;;  %v49_v9 = vstv %s158_s26  ;;  %s286_s9 = sld [smem:[#allocation2 + $0x6]]  ;;  %v45_v11 = vstv %s255_s25  ;;  %s292_s10 = sld [smem:[#allocation2 + $0x19]] }
  0x16   :  { %v50_v12 = vmul.f32 %v49_v9, %v260_v0  ;;  %v52_v13 = vstv %s262_s0  ;;  %s294_s11 = sld [smem:[#allocation2 + $0x10]]  ;;  %s298_s12 = sld [smem:[#allocation2 + $0x7]]  ;;  %v56_v19 = vstv %s264_s29 }
  0x17   :  { %v30_v14 = vmax.f32 %v29_v6, 0.0  ;;  %v42_v15 = vadd.f32 %v41_v5, %v39_v8  ;;  %v60_v16 = vstv %s266_s30  ;;  %v63_v17 = vstv %s268_s3  ;;  %s303_s13 = sld [smem:[#allocation2 + $0x1a]]  ;;  %s305_s14 = sld [smem:[#allocation2 + $0x11]] }
  0x18   :  { %v53_v18 = vadd.f32 %v52_v13, %v50_v12  ;;  %v61_v20 = vmul.f32 %v60_v16, %v260_v0  ;;  %v71_v21 = vstv %s272_s5  ;;  %s309_s15 = sld [smem:[#allocation2 + $0x8]]  ;;  %s311_s16 = sld [smem:[#allocation2 + $0x12]]  ;;  %v67_v28 = vstv %s270_s4 }
  0x19   :  { %v33_v22 = vmul.f32 %v32_v7, %v30_v14  ;;  %v43_v23 = vmax.f32 %v42_v15, 0.0  ;;  %v72_v24 = vmul.f32 %v71_v21, %v260_v0  ;;  %v74_v25 = vstv %s275_s1  ;;  %s315_s17 = sld [smem:[#allocation2 + $0x1b]]  ;;  %s318_s18 = sld [smem:[#allocation2 + $0x9]] }
  0x1a   :  { %v54_v26 = vmax.f32 %v53_v18, 0.0  ;;  %v64_v27 = vadd.f32 %v63_v17, %v61_v20  ;;  %v82_v29 = vstv %s280_s7  ;;  %s320_s19 = sld [smem:[#allocation2 + $0x13]]  ;;  %v78_v36 = vstv %s277_s6  ;;  %s325_s20 = sld [smem:[#allocation2 + $0x1c]] }
  0x1b   :  { %v36_v30 = vadd.f32 %v35_v10, %v33_v22  ;;  %v46_v31 = vmul.f32 %v45_v11, %v43_v23  ;;  %v75_v32 = vadd.f32 %v74_v25, %v72_v24  ;;  %v83_v33 = vmul.f32 %v82_v29, %v260_v0  ;;  %s181_s21 = sld [smem:[#allocation2 + $0x1d]]  ;;  %s221_s22 = smov [#allocation5]  }
  0x1c   :  { %v57_v34 = vmul.f32 %v56_v19, %v54_v26  ;;  %v65_v35 = vmax.f32 %v64_v27, 0.0  ;;  %v85_v37 = vstv %s282_s8  ;;  %v93_v41 = vstv %s286_s9  ;;  %s143_s23 = sshll.u32 %s221_s22, 4  ;;  %s144_s23 = int_to_ptr.vmem [resolvable:$true] %s143_s23 }
  0x1d   :  { %v47_v38 = vadd.f32 %v46_v31, %v36_v30  ;;  %v76_v39 = vmax.f32 %v75_v32, 0.0  ;;  %v86_v40 = vadd.f32 %v85_v37, %v83_v33  ;;  %v89_v43 = vstv %s292_s10  ;;  %s194_s24 = scalar_lea.vmem %s144_s23, 16  ;;  %s198_s25 = scalar_lea.vmem %s144_s23, 32 }
  0x1e   :  { %v68_v42 = vmul.f32 %v67_v28, %v65_v35  ;;  %v94_v44 = vmul.f32 %v93_v41, %v260_v0  ;;  %v96_v45 = vstv %s294_s11  ;;  %v104_v49 = vstv %s298_s12  ;;  %p195_p3 = scmp.ne.s32.totalorder %s144_s23, %s194_s24  ;;  %p199_p4 = scmp.lt.s32.totalorder %s144_s23, %s144_s23 }
  0x1f   :  { %v58_v46 = vadd.f32 %v57_v34, %v47_v38  ;;  %v79_v47 = vmul.f32 %v78_v36, %v76_v39  ;;  %v87_v48 = vmax.f32 %v86_v40, 0.0  ;;  %v100_v51 = vstv %s303_s13  ;;  %p200_p5 = scmp.lt.s32.totalorder %s198_s25, %s194_s24 }
  0x20   :  { %v97_v50 = vadd.f32 %v96_v45, %v94_v44  ;;  %v105_v52 = vmul.f32 %v104_v49, %v260_v0  ;;  %v107_v53 = vstv %s305_s14  ;;  %v115_v56 = vstv %s309_s15 }
  0x21   :  { %v69_v54 = vadd.f32 %v68_v42, %v58_v46  ;;  %v90_v55 = vmul.f32 %v89_v43, %v87_v48  ;;  %v118_v57 = vstv %s311_s16  ;;  %v116_v60 = vmul.f32 %v115_v56, %v260_v0  ;;  %p201_p6 = por %p200_p5, %p199_p4 }
  0x22   :  { %v98_v58 = vmax.f32 %v97_v50, 0.0  ;;  %v108_v59 = vadd.f32 %v107_v53, %v105_v52  ;;  %v111_v62 = vstv %s315_s17  ;;  %v126_v63 = vstv %s318_s18 }
  0x23   :  { %v80_v61 = vadd.f32 %v79_v47, %v69_v54  ;;  %v129_v1 = vstv %s320_s19  ;;  %v119_v4 = vadd.f32 %v118_v57, %v116_v60  ;;  %v127_v5 = vmul.f32 %v126_v63, %v260_v0  ;;  %p202_p7 = pnand %p201_p6, %p195_p3 }
  0x24   :  { %v101_v2 = vmul.f32 %v100_v51, %v98_v58  ;;  %v109_v3 = vmax.f32 %v108_v59, 0.0  ;;  %v122_v7 = vstv %s325_s20  ;;  %v133_v12 = vstv %s181_s21 }
  0x25   :  { %v91_v6 = vadd.f32 %v90_v55, %v80_v61  ;;  %v120_v9 = vmax.f32 %v119_v4, 0.0  ;;  %v130_v10 = vadd.f32 %v129_v1, %v127_v5 }
  0x26   :  { %v112_v8 = vmul.f32 %v111_v62, %v109_v3 }
  0x27   :  { %v102_v11 = vadd.f32 %v101_v2, %v91_v6  ;;  %v123_v13 = vmul.f32 %v122_v7, %v120_v9  ;;  %v131_v14 = vmax.f32 %v130_v10, 0.0 }
  0x29   :  { %v113_v15 = vadd.f32 %v112_v8, %v102_v11  ;;  %v134_v16 = vmul.f32 %v133_v12, %v131_v14 }
  0x2b   :  { %v124_v17 = vadd.f32 %v123_v13, %v113_v15 }
  0x2d   :  { %v135_v18 = vadd.f32 %v134_v16, %v124_v17 }
  0x2f   :  { %136 = vst [vmem:[#allocation5] sm:$0x1] %v135_v18 }
  0x30   :  { %205 = shalt.err (!%p202_p7)
}
  0x31   :  { %s206_s28 = scalar_lea.hbm %s356_s2, 16 }
  0x32   :  { %p207_p8 = scmp.ne.s32.totalorder %s356_s2, %s206_s28  ;;  %p210_p9 = scmp.lt.u32.totalorder %s206_s28, %s356_s2 }
  0x34   :  { %p212_p10 = pnand %p210_p9, %p207_p8 }
  0x36   :  { %215 = shalt.err (!%p212_p10)
}
  0x37   :  { %146 = dma.vmem_to_hbm [thread:$0]  %s144_s23, 16, %s356_s2, [#allocation3]  }
  0x38   :  { %218 = dma.done.wait [#allocation3], 16  }
  0x39   :  { %219 = vsyncadd [#allocation3], 4294967280 }
  0x3a   :  { %150 = vsyncpa [#allocation3], 1 }
  0x3b   :  { %151 = vsyncpa [#allocation4], 1 }

</bundles_post_ra>
